<compile_context>
chip_gen: v5e
topology: v5e:2x2
jax: 0.10.0
libtpu: 0.0.40
codegen_flags: <defaults>
</compile_context>

<pallas_src>
import functools

import jax
import jax.numpy as jnp
from jax import lax
from jax.experimental import pallas as pl
from jax.experimental.pallas import tpu as pltpu

MXU_DTYPE = jnp.bfloat16   # MXU operand dtype; accumulate + epilogue stay f32
MAX_TM = 512               # max lane tile for the M (= N*Ho*Wo) dimension


def _choose_tm(m):
    """Largest multiple-of-128 tile <= MAX_TM that keeps >= 2 grid steps."""
    tm = MAX_TM
    while tm > 128 and pl.cdiv(m, tm) < 2:
        tm //= 2
    return tm


def _vmem_limit(need_bytes):
    """Explicit scoped-VMEM budget: generous headroom, but safe on v7x (64 MiB)."""
    return int(max(16 * 1024 * 1024, min(32 * 1024 * 1024, 4 * need_bytes)))


# ----------------------------- Pallas kernels ------------------------------ #

def _conv1_shortcut_kernel(x_ref, w_ref, b_ref, h1_ref, res_ref, *, cout):
    # x_ref : (K, TM)      bf16 im2col patches (K on sublanes, M on lanes)
    # w_ref : (2*Cout, K)  bf16  [conv1*bn1_scale ; shortcut*bns_scale]
    # b_ref : (2*Cout, 1)  f32   folded BN bias
    acc = jnp.dot(w_ref[...], x_ref[...], preferred_element_type=jnp.float32)
    y = acc + b_ref[...]                              # (2*Cout, TM) f32
    h1_ref[...] = jnp.maximum(y[:cout, :], 0.0).astype(h1_ref.dtype)   # ReLU half
    res_ref[...] = y[cout:, :].astype(res_ref.dtype)                   # shortcut half


def _conv2_residual_kernel(x_ref, w_ref, b_ref, res_ref, o_ref):
    # x_ref : (K2, TM) bf16 im2col patches of h1; res_ref: (Cout, TM) f32
    acc = jnp.dot(w_ref[...], x_ref[...], preferred_element_type=jnp.float32)
    o_ref[...] = (acc + b_ref[...] + res_ref[...]).astype(o_ref.dtype)


# ------------------------------ wrappers ----------------------------------- #

def conv1_shortcut_matmul(patches_t, w_cat, b_cat, cout):
    """Fused conv1 + shortcut:  [2C,K] @ [K,M]  -> (h1 [C,M] bf16, res [C,M] f32)."""
    K, M = patches_t.shape
    tm = _choose_tm(M)
    need = tm * (K * 2 + cout * (2 + 4)) + w_cat.size * 2 + b_cat.size * 4
    h1, res = pl.pallas_call(
        functools.partial(_conv1_shortcut_kernel, cout=cout),
        out_shape=(jax.ShapeDtypeStruct((cout, M), MXU_DTYPE),      # h1 -> conv2 input
                   jax.ShapeDtypeStruct((cout, M), jnp.float32)),   # residual
        grid=(pl.cdiv(M, tm),),
        in_specs=[
            pl.BlockSpec((K, tm), lambda i: (0, i)),
            pl.BlockSpec((2 * cout, K), lambda i: (0, 0)),
            pl.BlockSpec((2 * cout, 1), lambda i: (0, 0)),
        ],
        out_specs=(pl.BlockSpec((cout, tm), lambda i: (0, i)),
                   pl.BlockSpec((cout, tm), lambda i: (0, i))),
        compiler_params=pltpu.CompilerParams(
            dimension_semantics=("parallel",),
            vmem_limit_bytes=_vmem_limit(need)),
    )(patches_t.astype(MXU_DTYPE), w_cat.astype(MXU_DTYPE), b_cat)
    return h1, res


def conv2_residual_matmul(patches_t, w2m, b2, residual, cout):
    """conv2 + folded BN + residual add:  [C,K2] @ [K2,M] + b + res -> [C,M] f32."""
    K, M = patches_t.shape
    tm = _choose_tm(M)
    need = tm * (K * 2 + cout * (4 + 4)) + w2m.size * 2 + b2.size * 4
    out = pl.pallas_call(
        _conv2_residual_kernel,
        out_shape=jax.ShapeDtypeStruct((cout, M), jnp.float32),
        grid=(pl.cdiv(M, tm),),
        in_specs=[
            pl.BlockSpec((K, tm), lambda i: (0, i)),
            pl.BlockSpec((cout, K), lambda i: (0, 0)),
            pl.BlockSpec((cout, 1), lambda i: (0, 0)),
            pl.BlockSpec((cout, tm), lambda i: (0, i)),
        ],
        out_specs=pl.BlockSpec((cout, tm), lambda i: (0, i)),
        compiler_params=pltpu.CompilerParams(
            dimension_semantics=("parallel",),
            vmem_limit_bytes=_vmem_limit(need)),
    )(patches_t.astype(MXU_DTYPE), w2m.astype(MXU_DTYPE), b2, residual)
    return out


# ------------------------------ JAX glue ------------------------------------ #

def im2col_t(x_cfirst, kh, kw, stride, padding, dilation):
    """x: [C, N, H, W] -> patches^T [kh*kw*C, N*Ho*Wo] (tap-major, C-minor)."""
    c, n, h, w = x_cfirst.shape
    xp = jnp.pad(x_cfirst, ((0, 0), (0, 0), (padding, padding), (padding, padding)))
    ho = (h + 2 * padding - dilation * (kh - 1) - 1) // stride + 1
    wo = (w + 2 * padding - dilation * (kw - 1) - 1) // stride + 1
    taps = []
    for i in range(kh):
        for j in range(kw):
            taps.append(xp[:, :,
                           i * dilation: i * dilation + (ho - 1) * stride + 1: stride,
                           j * dilation: j * dilation + (wo - 1) * stride + 1: stride])
    cat = jnp.stack(taps, axis=0)                   # [kh*kw, C, N, Ho, Wo]
    return cat.reshape(kh * kw * c, n * ho * wo), (n, ho, wo)


def conv_weight_to_mat_t(w_oihw):
    """[Cout, Cin, KH, KW] -> [Cout, KH*KW*Cin] matching im2col_t row ordering."""
    cout, cin, kh, kw = w_oihw.shape
    return jnp.transpose(w_oihw, (0, 2, 3, 1)).reshape(cout, kh * kw * cin)


def fold_bn_into_weight(w_mat, conv_bias, gamma, beta, mean, var, eps=1e-5):
    """BN(W x + conv_bias) == (W*scale) x + bias  (per output channel)."""
    scale = gamma / jnp.sqrt(var + eps)
    return w_mat * scale[:, None], (conv_bias - mean) * scale + beta


def residual_block_forward(x_nchw, p, *, kernel_size, stride, padding, dilation):
    cout = p["w1"].shape[0]
    x_cnhw = jnp.transpose(x_nchw, (1, 0, 2, 3))          # [Cin, N, H, W]

    # conv1 / shortcut share the same patch geometry -> one fused matmul.
    patches1, (n, ho, wo) = im2col_t(x_cnhw, kernel_size, kernel_size,
                                     stride, padding, dilation)
    w1m, b1 = fold_bn_into_weight(conv_weight_to_mat_t(p["w1"]), p["b1"],
                                  p["g1"], p["be1"], p["m1"], p["v1"])
    wsm, bs = fold_bn_into_weight(conv_weight_to_mat_t(p["ws"]), p["bs"],
                                  p["gs"], p["bes"], p["ms"], p["vs"])
    w_cat = jnp.concatenate([w1m, wsm], axis=0)                # [2*Cout, K]
    b_cat = jnp.concatenate([b1, bs], axis=0).reshape(-1, 1)   # [2*Cout, 1] f32
    h1, residual = conv1_shortcut_matmul(patches1, w_cat, b_cat, cout)

    # conv2: 3x3, stride 1, padding 1 on h1, with folded BN + residual add.
    h1_cnhw = h1.reshape(cout, n, ho, wo)
    patches2, _ = im2col_t(h1_cnhw, 3, 3, 1, 1, 1)
    w2m, b2 = fold_bn_into_weight(conv_weight_to_mat_t(p["w2"]), p["b2"],
                                  p["g2"], p["be2"], p["m2"], p["v2"])
    out = conv2_residual_matmul(patches2, w2m, b2.reshape(-1, 1), residual, cout)

    # [Cout, N*Ho*Wo] -> NCHW
    return jnp.transpose(out.reshape(cout, n, ho, wo), (1, 0, 2, 3))


# ------------------------- pure-JAX reference ------------------------------- #

def _conv_ref(x, w, b, stride, padding, dilation):
    y = lax.conv_general_dilated(
        x, w, window_strides=(stride, stride),
        padding=[(padding, padding), (padding, padding)],
        rhs_dilation=(dilation, dilation),
        dimension_numbers=("NCHW", "OIHW", "NCHW"))
    return y + b.reshape(1, -1, 1, 1)


def _bn_ref(x, gamma, beta, mean, var, eps=1e-5):
    inv = gamma.reshape(1, -1, 1, 1) / jnp.sqrt(var.reshape(1, -1, 1, 1) + eps)
    return (x - mean.reshape(1, -1, 1, 1)) * inv + beta.reshape(1, -1, 1, 1)


def residual_block_ref(x, p, *, kernel_size, stride, padding, dilation):
    res = _bn_ref(_conv_ref(x, p["ws"], p["bs"], stride, padding, dilation),
                  p["gs"], p["bes"], p["ms"], p["vs"])
    h = jnp.maximum(_bn_ref(_conv_ref(x, p["w1"], p["b1"], stride, padding, dilation),
                            p["g1"], p["be1"], p["m1"], p["v1"]), 0.0)
    h = _bn_ref(_conv_ref(h, p["w2"], p["b2"], 1, 1, 1),
                p["g2"], p["be2"], p["m2"], p["v2"])
    return h + res


# --------------------------------- main ------------------------------------- #

if __name__ == "__main__":
    in_channels, out_channels = 4, 8
    kernel_size, stride, padding, dilation = 3, 1, 1, 1
    N, H, W = 2, 16, 16

    key = jax.random.PRNGKey(0)
    ks = jax.random.split(key, 20)

    def nrm(k, shape, s=0.1):
        return s * jax.random.normal(k, shape, dtype=jnp.float32)

    params = {
        # conv1 + bn1
        "w1": nrm(ks[0], (out_channels, in_channels, kernel_size, kernel_size)),
        "b1": nrm(ks[1], (out_channels,)),
        "g1": 1.0 + nrm(ks[2], (out_channels,)),
        "be1": nrm(ks[3], (out_channels,)),
        "m1": nrm(ks[4], (out_channels,)),
        "v1": jax.random.uniform(ks[5], (out_channels,), jnp.float32, 0.5, 1.5),
        # conv2 + bn2
        "w2": nrm(ks[6], (out_channels, out_channels, 3, 3)),
        "b2": nrm(ks[7], (out_channels,)),
        "g2": 1.0 + nrm(ks[8], (out_channels,)),
        "be2": nrm(ks[9], (out_channels,)),
        "m2": nrm(ks[10], (out_channels,)),
        "v2": jax.random.uniform(ks[11], (out_channels,), jnp.float32, 0.5, 1.5),
        # shortcut conv + bn
        "ws": nrm(ks[12], (out_channels, in_channels, kernel_size, kernel_size)),
        "bs": nrm(ks[13], (out_channels,)),
        "gs": 1.0 + nrm(ks[14], (out_channels,)),
        "bes": nrm(ks[15], (out_channels,)),
        "ms": nrm(ks[16], (out_channels,)),
        "vs": jax.random.uniform(ks[17], (out_channels,), jnp.float32, 0.5, 1.5),
    }

    x = jax.random.normal(ks[18], (N, in_channels, H, W), dtype=jnp.float32)

    fwd = jax.jit(functools.partial(residual_block_forward,
                                    kernel_size=kernel_size, stride=stride,
                                    padding=padding, dilation=dilation))
    out = fwd(x, params)
    jax.block_until_ready(out)

    ref = residual_block_ref(x, params, kernel_size=kernel_size, stride=stride,
                             padding=padding, dilation=dilation)
    assert out.shape == ref.shape == (N, out_channels, H, W)
    # bf16 MXU operands (f32 accumulate) => relaxed tolerance vs. the f32 reference.
    assert jnp.allclose(out, ref, rtol=5e-2, atol=5e-2), \
        f"max err {jnp.max(jnp.abs(out - ref))}"

    print("KERNEL_OK")
</pallas_src>

<mosaic_0001>
module attributes {stable_mosaic.version = 11 : i64} {
  func.func @_conv1_shortcut_kernel(%arg0: i32, %arg1: memref<36x256xbf16, #tpu.memory_space<vmem>>, %arg2: memref<16x36xbf16, #tpu.memory_space<vmem>>, %arg3: memref<16x1xf32, #tpu.memory_space<vmem>>, %arg4: memref<8x256xbf16, #tpu.memory_space<vmem>>, %arg5: memref<8x256xf32, #tpu.memory_space<vmem>>) attributes {dimension_semantics = [#tpu.dimension_semantics<parallel>], iteration_bounds = array<i64: 2>, scalar_prefetch = 0 : i64, scratch_operands = 0 : i64, tpu.core_type = #tpu.core_type<tc>, window_params = [{transform_indices = @transform_0, window_bounds = array<i64: 36, 256>}, {pipeline_mode = #tpu.pipeline_mode<synchronous>, transform_indices = @transform_1, window_bounds = array<i64: 16, 36>}, {pipeline_mode = #tpu.pipeline_mode<synchronous>, transform_indices = @transform_2, window_bounds = array<i64: 16, 1>}, {transform_indices = @transform_3, window_bounds = array<i64: 8, 256>}, {transform_indices = @transform_4, window_bounds = array<i64: 8, 256>}]} {
    %c0 = arith.constant 0 : index
    %c0_0 = arith.constant 0 : index
    %0 = vector.load %arg2[%c0, %c0_0] : memref<16x36xbf16, #tpu.memory_space<vmem>>, vector<16x36xbf16>
    %c0_1 = arith.constant 0 : index
    %c0_2 = arith.constant 0 : index
    %1 = vector.load %arg1[%c0_1, %c0_2] : memref<36x256xbf16, #tpu.memory_space<vmem>>, vector<36x256xbf16>
    %cst = arith.constant dense<0.000000e+00> : vector<16x256xf32>
    %2 = tpu.matmul %0, %1, %cst {dimension_numbers = #tpu.dot_dimension_numbers<[1], [0], [0], [1], [0, 0, 1, 1], [], []>} : vector<16x36xbf16>, vector<36x256xbf16>, vector<16x256xf32> -> vector<16x256xf32>
    %c0_3 = arith.constant 0 : index
    %c0_4 = arith.constant 0 : index
    %3 = vector.load %arg3[%c0_3, %c0_4] : memref<16x1xf32, #tpu.memory_space<vmem>>, vector<16x1xf32>
    %4 = vector.broadcast %3 : vector<16x1xf32> to vector<16x256xf32>
    %5 = arith.addf %2, %4 : vector<16x256xf32>
    %6 = vector.extract_strided_slice %5 {offsets = [0, 0], sizes = [8, 256], strides = [1, 1]} : vector<16x256xf32> to vector<8x256xf32>
    %cst_5 = arith.constant 0.000000e+00 : f32
    %7 = vector.broadcast %cst_5 : f32 to vector<8x256xf32>
    %8 = arith.maximumf %6, %7 : vector<8x256xf32>
    %9 = arith.truncf %8 : vector<8x256xf32> to vector<8x256xbf16>
    %c0_6 = arith.constant 0 : index
    %c0_7 = arith.constant 0 : index
    %10 = vector.load %arg4[%c0_6, %c0_7] : memref<8x256xbf16, #tpu.memory_space<vmem>>, vector<8x256xbf16>
    tpu.vector_store %arg4[%c0_6, %c0_7], %9 {strides = array<i32>} : memref<8x256xbf16, #tpu.memory_space<vmem>>, vector<8x256xbf16>,
    %11 = vector.extract_strided_slice %5 {offsets = [8, 0], sizes = [8, 256], strides = [1, 1]} : vector<16x256xf32> to vector<8x256xf32>
    %c0_8 = arith.constant 0 : index
    %c0_9 = arith.constant 0 : index
    %12 = vector.load %arg5[%c0_8, %c0_9] : memref<8x256xf32, #tpu.memory_space<vmem>>, vector<8x256xf32>
    tpu.vector_store %arg5[%c0_8, %c0_9], %11 {strides = array<i32>} : memref<8x256xf32, #tpu.memory_space<vmem>>, vector<8x256xf32>,
    return
  }
  func.func @transform_0(%arg0: i32) -> (i32, i32) {
    %c0_i32 = arith.constant 0 : i32
    %c0_i32_0 = arith.constant 0 : i32
    return %c0_i32, %arg0 : i32, i32
  }
  func.func @transform_1(%arg0: i32) -> (i32, i32) {
    %c0_i32 = arith.constant 0 : i32
    %c0_i32_0 = arith.constant 0 : i32
    %c0_i32_1 = arith.constant 0 : i32
    return %c0_i32, %c0_i32_0 : i32, i32
  }
  func.func @transform_2(%arg0: i32) -> (i32, i32) {
    %c0_i32 = arith.constant 0 : i32
    %c0_i32_0 = arith.constant 0 : i32
    %c0_i32_1 = arith.constant 0 : i32
    return %c0_i32, %c0_i32_0 : i32, i32
  }
  func.func @transform_3(%arg0: i32) -> (i32, i32) {
    %c0_i32 = arith.constant 0 : i32
    %c0_i32_0 = arith.constant 0 : i32
    return %c0_i32, %arg0 : i32, i32
  }
  func.func @transform_4(%arg0: i32) -> (i32, i32) {
    %c0_i32 = arith.constant 0 : i32
    %c0_i32_0 = arith.constant 0 : i32
    return %c0_i32, %arg0 : i32, i32
  }
}

module attributes {stable_mosaic.version = 11 : i64} {
  func.func @_conv2_residual_kernel(%arg0: i32, %arg1: memref<72x256xbf16, #tpu.memory_space<vmem>>, %arg2: memref<8x72xbf16, #tpu.memory_space<vmem>>, %arg3: memref<8x1xf32, #tpu.memory_space<vmem>>, %arg4: memref<8x256xf32, #tpu.memory_space<vmem>>, %arg5: memref<8x256xf32, #tpu.memory_space<vmem>>) attributes {dimension_semantics = [#tpu.dimension_semantics<parallel>], iteration_bounds = array<i64: 2>, scalar_prefetch = 0 : i64, scratch_operands = 0 : i64, tpu.core_type = #tpu.core_type<tc>, window_params = [{transform_indices = @transform_0, window_bounds = array<i64: 72, 256>}, {pipeline_mode = #tpu.pipeline_mode<synchronous>, transform_indices = @transform_1, window_bounds = array<i64: 8, 72>}, {pipeline_mode = #tpu.pipeline_mode<synchronous>, transform_indices = @transform_2, window_bounds = array<i64: 8, 1>}, {transform_indices = @transform_3, window_bounds = array<i64: 8, 256>}, {transform_indices = @transform_4, window_bounds = array<i64: 8, 256>}]} {
    %c0 = arith.constant 0 : index
    %c0_0 = arith.constant 0 : index
    %0 = vector.load %arg2[%c0, %c0_0] : memref<8x72xbf16, #tpu.memory_space<vmem>>, vector<8x72xbf16>
    %c0_1 = arith.constant 0 : index
    %c0_2 = arith.constant 0 : index
    %1 = vector.load %arg1[%c0_1, %c0_2] : memref<72x256xbf16, #tpu.memory_space<vmem>>, vector<72x256xbf16>
    %cst = arith.constant dense<0.000000e+00> : vector<8x256xf32>
    %2 = tpu.matmul %0, %1, %cst {dimension_numbers = #tpu.dot_dimension_numbers<[1], [0], [0], [1], [0, 0, 1, 1], [], []>} : vector<8x72xbf16>, vector<72x256xbf16>, vector<8x256xf32> -> vector<8x256xf32>
    %c0_3 = arith.constant 0 : index
    %c0_4 = arith.constant 0 : index
    %3 = vector.load %arg3[%c0_3, %c0_4] : memref<8x1xf32, #tpu.memory_space<vmem>>, vector<8x1xf32>
    %4 = vector.broadcast %3 : vector<8x1xf32> to vector<8x256xf32>
    %5 = arith.addf %2, %4 : vector<8x256xf32>
    %c0_5 = arith.constant 0 : index
    %c0_6 = arith.constant 0 : index
    %6 = vector.load %arg4[%c0_5, %c0_6] : memref<8x256xf32, #tpu.memory_space<vmem>>, vector<8x256xf32>
    %7 = arith.addf %5, %6 : vector<8x256xf32>
    %c0_7 = arith.constant 0 : index
    %c0_8 = arith.constant 0 : index
    %8 = vector.load %arg5[%c0_7, %c0_8] : memref<8x256xf32, #tpu.memory_space<vmem>>, vector<8x256xf32>
    tpu.vector_store %arg5[%c0_7, %c0_8], %7 {strides = array<i32>} : memref<8x256xf32, #tpu.memory_space<vmem>>, vector<8x256xf32>,
    return
  }
  func.func @transform_0(%arg0: i32) -> (i32, i32) {
    %c0_i32 = arith.constant 0 : i32
    %c0_i32_0 = arith.constant 0 : i32
    return %c0_i32, %arg0 : i32, i32
  }
  func.func @transform_1(%arg0: i32) -> (i32, i32) {
    %c0_i32 = arith.constant 0 : i32
    %c0_i32_0 = arith.constant 0 : i32
    %c0_i32_1 = arith.constant 0 : i32
    return %c0_i32, %c0_i32_0 : i32, i32
  }
  func.func @transform_2(%arg0: i32) -> (i32, i32) {
    %c0_i32 = arith.constant 0 : i32
    %c0_i32_0 = arith.constant 0 : i32
    %c0_i32_1 = arith.constant 0 : i32
    return %c0_i32, %c0_i32_0 : i32, i32
  }
  func.func @transform_3(%arg0: i32) -> (i32, i32) {
    %c0_i32 = arith.constant 0 : i32
    %c0_i32_0 = arith.constant 0 : i32
    return %c0_i32, %arg0 : i32, i32
  }
  func.func @transform_4(%arg0: i32) -> (i32, i32) {
    %c0_i32 = arith.constant 0 : i32
    %c0_i32_0 = arith.constant 0 : i32
    return %c0_i32, %arg0 : i32, i32
  }
}

</mosaic_0001>

<bundles_post_ra>
// kernel: residual_block_forward.2
= control target key start
LH: loop header
LB: loop body
LE: loop exit
PB: predicated region body
PF: predicated region fallthrough
CT: control target
= control target key end

     0   :  { %s576_s15 = smov 0   ;;  %s578_s16 = smov 0   ;;  %s640_s0 = inlined_call_operand.vmem [shape: bf16[36,512], index: 0, kind: input, shape index: {}]   ;;  %s641_s1 = inlined_call_operand.vmem [shape: bf16[16,36], index: 1, kind: input, shape index: {}]   ;;  %s642_s2 = inlined_call_operand.vmem [shape: f32[16,1], index: 2, kind: input, shape index: {}]   ;;  %s643_s3 = inlined_call_operand.vmem [shape: bf16[8,512], index: 3, kind: output, shape index: {0}]   ;;  %s644_s4 = inlined_call_operand.vmem [shape: f32[8,512], index: 4, kind: output, shape index: {1}]  }
   0x1   :  { %s580_s17 = smov 0  }
   0x2 LB: > { %s457_s18 = sadd.s32 4294967295, %s548_s17   ;;  %s593_s19 = sadd.s32 1, %s548_s17   ;;  %s548_s17 = sphi %s580_s17, %s647_s17   ;;  %s544_s16 = sphi %s578_s16, %s646_s16   ;;  %s540_s15 = sphi %s576_s15, %s645_s15  }
   0x3   : > { %s19_s20 = ssub.s32 %s548_s17, %s593_s19  ;;  %s22_s21 = sadd.s32 1, %s544_s16 }
   0x4   : > { %p20_p0 = scmp.eq.s32.totalorder %s19_s20, 0  ;;  %p29_p1 = scmp.ne.s32.totalorder %s544_s16, %s540_s15 }
   0x5   : > { %p30_p2 = scmp.eq.s32.totalorder %s548_s17, 0  ;;  %p460_p4 = scmp.ge.s32.totalorder %s548_s17, 2 }
   0x6   : > { %s602_s22 = scalar_select %p20_p0, %s544_s16, %s22_s21  }
   0x7   : > { %p31_p3 = por %p30_p2, %p29_p1  ;;  %155 = sbr.rel (%p460_p4) target bundleno = 21 (0x15), region = 24 }
   0xc   : > { %158 = sbr.rel (!%p31_p3) target bundleno = 21 (0x15), region = 28  ;;  %s160_s23 = sand.u32 (%p31_p3), 1, %s544_s16  }
   0xd   : > { %s492_s24 = sshll.u32 (%p31_p3), %s548_s17, 3  ;;  %s498_s25 = smul.u32 (%p31_p3), 40, %s160_s23 }
   0xe   : > { %s165_s28 = scalar_lea.vmem (%p31_p3), %s640_s0, %s492_s24 }
   0xf   : > { %v202_v0 = vld [vmem:[%s165_s28] sm:$0xff] (%p31_p3)  ;;  %v204_v1 = vld [vmem:[%s165_s28 + $0x10] sm:$0xff] (%p31_p3)  ;;  %s162_s29 = scalar_lea.vmem (%p31_p3), [#allocation2], %s498_s25 }
  0x10   : > { %v206_v2 = vld [vmem:[%s165_s28 + $0x20] sm:$0xff] (%p31_p3)  ;;  %203 = vst [vmem:[%s162_s29] sm:$0xff] (%p31_p3), %v202_v0  ;;  %v208_v3 = vld [vmem:[%s165_s28 + $0x30] sm:$0xff] (%p31_p3) }
  0x11   : > { %205 = vst [vmem:[%s162_s29 + $0x8] sm:$0xff] %v204_v1  ;;  %v210_v4 = vld [vmem:[%s165_s28 + $0x40] sm:$0xff] }
  0x12   : > { %207 = vst [vmem:[%s162_s29 + $0x10] sm:$0xff] %v206_v2 }
  0x13   : > { %209 = vst [vmem:[%s162_s29 + $0x18] sm:$0xff] %v208_v3 }
  0x14   : > { %211 = vst [vmem:[%s162_s29 + $0x20] sm:$0xff] %v210_v4 }
  0x15 PF: > { %p463_p5 = scmp.ge.s32.totalorder %s548_s17, 1  ;;  %p216_p6 = scmp.lt.s32.totalorder %s548_s17, 3 }
  0x17   : > { %p217_p7 = pnand %p463_p5, %p216_p6 }
  0x18   : > { %s223_s30 = sand.u32 (!%p217_p7), 1, %s540_s15   ;;  %s464_s13 = sshll.u32 (!%p217_p7), %s457_s18, 1 }
  0x19   : > { %220 = sbr.rel (%p217_p7) target bundleno = 186 (0xba), region = 66  ;;  %p255_p8 = scmp.lt.s32.totalorder (!%p217_p7), %s464_s13, 3 }
  0x1a   : > { %s499_s7 = smul.u32 (!%p217_p7), 40, %s223_s30 }
  0x1c   : > { %s225_s8 = scalar_lea.vmem (!%p217_p7), [#allocation2], %s499_s7 }
  0x1e   : > { %v274_v5 = vld [vmem:[%s642_s2] sm:$0xff]  ;;  %v550_v6 = vmov 0   ;;  %vm320_vm0 = vcmask 1041408   ;;  %v482_v10 = vld [vmem:[%s225_s8 + $0x10] sm:$0xf]  ;;  %v275_v16 = vld [vmem:[%s642_s2 + $0x8] sm:$0xff] }
  0x1f   : > { %525 = vset.pattern.permute.xlu0 %v550_v6  ;;  %v273_v7 = vld [vmem:[%s225_s8 + $0x20] sm:$0x33]  ;;  %v497_v13 = vld [vmem:[%s225_s8 + $0x14] sm:$0xf0]  ;;  %v496_v14 = vld [vmem:[%s225_s8 + $0x14] sm:$0xf] }
  0x20   : > { %278 = vperm.xlu0 %525, %v274_v5   ;;  %v304_v8 = vunpack.c.l.b16 %v273_v7  ;;  %v305_v9 = vunpack.c.h.b16 %v273_v7  ;;  %v484_v15 = vld [vmem:[%s225_s8 + $0x18] sm:$0xf0]  ;;  %v483_v19 = vor.u32 %v497_v13, %v482_v10  ;;  %v474_v21 = vld [vmem:[%s225_s8] sm:$0xf]  ;;  %v495_v22 = vld [vmem:[%s225_s8 + $0x4] sm:$0xf0] }
  0x21   : > { %v487_v20 = vor.u32 %v496_v14, %v484_v15  ;;  %v494_v23 = vld [vmem:[%s225_s8 + $0x4] sm:$0xf]  ;;  %v476_v24 = vld [vmem:[%s225_s8 + $0x8] sm:$0xf0]  ;;  %v475_v25 = vor.u32 %v495_v22, %v474_v21  ;;  %vm316_vm1 = vcmask 293888   ;;  %s649_s13 = smov (!%p255_p8, %s464_s13), 3 }
  0x22   : > { %v310_v11 = vpack.c.b16 %v304_v8, %v304_v8  ;;  %v311_v12 = vpack.c.b16 %v305_v9, %v305_v9  ;;  %v479_v26 = vor.u32 %v494_v23, %v476_v24  ;;  %v493_v27 = vld [vmem:[%s641_s1] sm:$0xff]  ;;  %s465_s14 = sshll.u32 %s649_s13, 2  ;;  %s467_s23 = sshll.u32 %s649_s13, 3 }
  0x23   : > { %s258_s21 = scalar_lea.vmem %s643_s3, %s465_s14  ;;  %s264_s24 = scalar_lea.vmem %s644_s4, %s467_s23 }
  0x24   : > { %v322_v17 = vsel %vm320_vm0, %v310_v11, 0  ;;  %v325_v18 = vsel %vm320_vm0, %v311_v12, 0 }
  0x25   : > { %332 = vmatpush.bf16.msra.mxu0 %v322_v17  ;;  %346 = vmatpush.bf16.msra.mxu1 %v325_v18 }
  0x28   : > { %283 = vperm.xlu0 %525, %v275_v16  }
  0x29   : > { %333 = vmatpush.bf16.msra.mxu0 %v483_v19  ;;  %347 = vmatpush.bf16.msra.mxu1 %v487_v20 }
  0x2d   : > { %334 = vmatpush.bf16.msra.mxu0 %v475_v25  ;;  %348 = vmatpush.bf16.msra.mxu1 %v479_v26 }
  0x30   : > { %488 = vmatmul.msk.bf16.vlgmr.msra.gmra.mxu0 %vm316_vm1, %v493_v27  ;;  %489 = vmatmul.msk.bf16.vlgmr.msra.gmra.mxu1 %vm316_vm1, %v493_v27 }
  0x92   : > { %v279_v28 = vpop.permute.xlu0 %278 }
  0x9a   : > { %v284_v36 = vpop.permute.xlu0 %283 }
  0xad   : > { %v336_v29 = vpop.f32.mrf.mxu0  ;;  %v350_v30 = vpop.f32.mrf.mxu1 }
  0xae   : > { %v337_v31 = vadd.f32 %v336_v29, %v279_v28  ;;  %v351_v32 = vadd.f32 %v350_v30, %v279_v28 }
  0xb0   : > { %v355_v33 = vmax.f32 %v337_v31, 0.0  ;;  %v356_v34 = vmax.f32 %v351_v32, 0.0 }
  0xb2   : > { %v357_v35 = vpack.c.bf16 %v356_v34, %v355_v33 }
  0xb4   : > { %358 = vst [vmem:[%s258_s21] sm:$0xff] %v357_v35 }
  0xb5   : > { %v338_v37 = vpop.f32.mrf.mxu0  ;;  %v352_v38 = vpop.f32.mrf.mxu1 }
  0xb6   : > { %v339_v39 = vadd.f32 %v338_v37, %v284_v36  ;;  %v353_v40 = vadd.f32 %v352_v38, %v284_v36 }
  0xb8   : > { %359 = vst [vmem:[%s264_s24] sm:$0xff] %v339_v39 }
  0xb9   : > { %360 = vst [vmem:[%s264_s24 + $0x8] sm:$0xff] %v353_v40 }
  0xba PF: > { %p12_p9 = scmp.ge.s32.totalorder %s593_s19, 4   ;;  %s645_s15 = smov %s544_s16 }
  0xbb   : > { %s646_s16 = smov %s602_s22  ;;  %s647_s17 = smov %s593_s19 }
  0xbc   :  { %14 = sbr.rel (!%p12_p9) target bundleno = 2 (0x2), region = 117 }

// kernel: residual_block_forward.3
= control target key start
LH: loop header
LB: loop body
LE: loop exit
PB: predicated region body
PF: predicated region fallthrough
CT: control target
= control target key end

     0   :  { %s603_s15 = smov 0   ;;  %s605_s16 = smov 0   ;;  %s683_s0 = inlined_call_operand.vmem [shape: bf16[72,512], index: 0, kind: input, shape index: {}]   ;;  %s684_s1 = inlined_call_operand.vmem [shape: bf16[8,72], index: 1, kind: input, shape index: {}]   ;;  %s685_s2 = inlined_call_operand.vmem [shape: f32[8,1], index: 2, kind: input, shape index: {}]   ;;  %s686_s3 = inlined_call_operand.vmem [shape: f32[8,512], index: 3, kind: input, shape index: {}]   ;;  %s687_s4 = inlined_call_operand.vmem [shape: f32[8,512], index: 4, kind: output, shape index: {}]  }
   0x1   :  { %s607_s17 = smov 0  }
   0x2 LB: > { %s469_s18 = sadd.s32 4294967295, %s575_s17   ;;  %s620_s19 = sadd.s32 1, %s575_s17   ;;  %s575_s17 = sphi %s607_s17, %s690_s17   ;;  %s571_s16 = sphi %s605_s16, %s689_s16   ;;  %s567_s15 = sphi %s603_s15, %s688_s15  }
   0x3   : > { %s18_s20 = ssub.s32 %s575_s17, %s620_s19  ;;  %s21_s21 = sadd.s32 1, %s571_s16 }
   0x4   : > { %p19_p0 = scmp.eq.s32.totalorder %s18_s20, 0  ;;  %p28_p1 = scmp.ne.s32.totalorder %s571_s16, %s567_s15 }
   0x5   : > { %p29_p2 = scmp.eq.s32.totalorder %s575_s17, 0  ;;  %p472_p4 = scmp.ge.s32.totalorder %s575_s17, 2 }
   0x6   : > { %s629_s22 = scalar_select %p19_p0, %s571_s16, %s21_s21  }
   0x7   : > { %p30_p3 = por %p29_p2, %p28_p1  ;;  %154 = sbr.rel (%p472_p4) target bundleno = 25 (0x19), region = 24 }
   0xc   : > { %157 = sbr.rel (!%p30_p3) target bundleno = 25 (0x19), region = 28  ;;  %s159_s23 = sand.u32 (%p30_p3), 1, %s571_s16  }
   0xd   : > { %s516_s24 = sshll.u32 (%p30_p3), %s575_s17, 3  ;;  %s525_s25 = smul.u32 (%p30_p3), 72, %s159_s23 }
   0xe   : > { %s164_s28 = scalar_lea.vmem (%p30_p3), %s683_s0, %s516_s24 }
   0xf   : > { %v209_v0 = vld [vmem:[%s164_s28] sm:$0xff] (%p30_p3)  ;;  %v211_v1 = vld [vmem:[%s164_s28 + $0x10] sm:$0xff] (%p30_p3)  ;;  %s161_s29 = scalar_lea.vmem (%p30_p3), [#allocation2], %s525_s25 }
  0x10   : > { %v213_v2 = vld [vmem:[%s164_s28 + $0x20] sm:$0xff] (%p30_p3)  ;;  %210 = vst [vmem:[%s161_s29] sm:$0xff] (%p30_p3), %v209_v0  ;;  %v215_v3 = vld [vmem:[%s164_s28 + $0x30] sm:$0xff] (%p30_p3) }
  0x11   : > { %212 = vst [vmem:[%s161_s29 + $0x8] sm:$0xff] %v211_v1  ;;  %v217_v4 = vld [vmem:[%s164_s28 + $0x40] sm:$0xff]  ;;  %v219_v5 = vld [vmem:[%s164_s28 + $0x50] sm:$0xff] }
  0x12   : > { %214 = vst [vmem:[%s161_s29 + $0x10] sm:$0xff] %v213_v2  ;;  %v221_v6 = vld [vmem:[%s164_s28 + $0x60] sm:$0xff]  ;;  %v223_v7 = vld [vmem:[%s164_s28 + $0x70] sm:$0xff] }
  0x13   : > { %216 = vst [vmem:[%s161_s29 + $0x18] sm:$0xff] %v215_v3  ;;  %v225_v8 = vld [vmem:[%s164_s28 + $0x80] sm:$0xff] }
  0x14   : > { %218 = vst [vmem:[%s161_s29 + $0x20] sm:$0xff] %v217_v4 }
  0x15   : > { %220 = vst [vmem:[%s161_s29 + $0x28] sm:$0xff] %v219_v5 }
  0x16   : > { %222 = vst [vmem:[%s161_s29 + $0x30] sm:$0xff] %v221_v6 }
  0x17   : > { %224 = vst [vmem:[%s161_s29 + $0x38] sm:$0xff] %v223_v7 }
  0x18   : > { %226 = vst [vmem:[%s161_s29 + $0x40] sm:$0xff] %v225_v8 }
  0x19 PF: > { %p475_p5 = scmp.ge.s32.totalorder %s575_s17, 1  ;;  %p240_p6 = scmp.lt.s32.totalorder %s575_s17, 3 }
  0x1b   : > { %p241_p7 = pnand %p475_p5, %p240_p6 }
  0x1c   : > { %s247_s30 = sand.u32 (!%p241_p7), 1, %s567_s15   ;;  %s476_s11 = sshll.u32 (!%p241_p7), %s469_s18, 1 }
  0x1d   : > { %244 = sbr.rel (%p241_p7) target bundleno = 194 (0xc2), region = 70  ;;  %p279_p8 = scmp.lt.s32.totalorder (!%p241_p7), %s476_s11, 3 }
  0x1e   : > { %s526_s5 = smul.u32 (!%p241_p7), 72, %s247_s30 }
  0x20   : > { %s643_s8 = scalar_lea.vmem (!%p241_p7), [#allocation2], %s526_s5 }
  0x22   : > { %v577_v9 = vmov 0   ;;  %v301_v10 = vld [vmem:[%s685_s2] sm:$0xff]  ;;  %vm356_vm0 = vcmask 1043456   ;;  %v506_v14 = vld [vmem:[%s643_s8 + $0x30] sm:$0xf]  ;;  %vm352_vm1 = vcmask 588800  }
  0x23   : > { %552 = vset.pattern.permute.xlu0 %v577_v9  ;;  %v300_v11 = vld [vmem:[%s643_s8 + $0x40] sm:$0xff]  ;;  %v524_v17 = vld [vmem:[%s643_s8 + $0x34] sm:$0xf0]  ;;  %v523_v18 = vld [vmem:[%s643_s8 + $0x34] sm:$0xf]  ;;  %s692_s11 = smov (!%p279_p8, %s476_s11), 3 }
  0x24   : > { %304 = vperm.xlu0 %552, %v301_v10   ;;  %v332_v12 = vunpack.c.l.b16 %v300_v11  ;;  %v333_v13 = vunpack.c.h.b16 %v300_v11  ;;  %v508_v19 = vld [vmem:[%s643_s8 + $0x38] sm:$0xf0]  ;;  %v507_v22 = vor.u32 %v524_v17, %v506_v14  ;;  %v498_v24 = vld [vmem:[%s643_s8 + $0x20] sm:$0xf]  ;;  %v522_v25 = vld [vmem:[%s643_s8 + $0x24] sm:$0xf0] }
  0x25   : > { %v511_v23 = vor.u32 %v523_v18, %v508_v19  ;;  %v521_v26 = vld [vmem:[%s643_s8 + $0x24] sm:$0xf]  ;;  %v500_v27 = vld [vmem:[%s643_s8 + $0x28] sm:$0xf0]  ;;  %v499_v28 = vor.u32 %v522_v25, %v498_v24  ;;  %v490_v30 = vld [vmem:[%s643_s8 + $0x10] sm:$0xf] }
  0x26   : > { %v342_v15 = vpack.c.b16 %v332_v12, %v332_v12  ;;  %v343_v16 = vpack.c.b16 %v333_v13, %v333_v13  ;;  %v503_v29 = vor.u32 %v521_v26, %v500_v27  ;;  %v520_v31 = vld [vmem:[%s643_s8 + $0x14] sm:$0xf0]  ;;  %v519_v32 = vld [vmem:[%s643_s8 + $0x14] sm:$0xf]  ;;  %v492_v33 = vld [vmem:[%s643_s8 + $0x18] sm:$0xf0] }
  0x27   : > { %v491_v34 = vor.u32 %v520_v31, %v490_v30  ;;  %v495_v35 = vor.u32 %v519_v32, %v492_v33  ;;  %v482_v36 = vld [vmem:[%s643_s8] sm:$0xf]  ;;  %v518_v37 = vld [vmem:[%s643_s8 + $0x4] sm:$0xf0]  ;;  %v517_v38 = vld [vmem:[%s643_s8 + $0x4] sm:$0xf] }
  0x28   : > { %v358_v20 = vsel %vm356_vm0, %v342_v15, 0  ;;  %v361_v21 = vsel %vm356_vm0, %v343_v16, 0  ;;  %v484_v39 = vld [vmem:[%s643_s8 + $0x8] sm:$0xf0]  ;;  %v483_v40 = vor.u32 %v518_v37, %v482_v36  ;;  %v291_v42 = vld [vmem:[%s684_s1] sm:$0xf] }
  0x29   : > { %366 = vmatpush.bf16.msra.mxu0 %v358_v20  ;;  %379 = vmatpush.bf16.msra.mxu1 %v361_v21  ;;  %v487_v41 = vor.u32 %v517_v38, %v484_v39  ;;  %s477_s12 = sshll.u32 %s692_s11, 3 }
  0x2a   : > { %s282_s15 = scalar_lea.vmem %s686_s3, %s477_s12  ;;  %s288_s23 = scalar_lea.vmem %s687_s4, %s477_s12 }
  0x2b   : > { %v389_v45 = vld [vmem:[%s282_s15] sm:$0xff]  ;;  %v390_v47 = vld [vmem:[%s282_s15 + $0x8] sm:$0xff] }
  0x2d   : > { %367 = vmatpush.bf16.msra.mxu0 %v507_v22  ;;  %380 = vmatpush.bf16.msra.mxu1 %v511_v23 }
  0x31   : > { %368 = vmatpush.bf16.msra.mxu0 %v499_v28  ;;  %381 = vmatpush.bf16.msra.mxu1 %v503_v29 }
  0x35   : > { %369 = vmatpush.bf16.msra.mxu0 %v491_v34  ;;  %382 = vmatpush.bf16.msra.mxu1 %v495_v35 }
  0x39   : > { %370 = vmatpush.bf16.msra.mxu0 %v483_v40  ;;  %383 = vmatpush.bf16.msra.mxu1 %v487_v41 }
  0x3c   : > { %512 = vmatmul.msk.bf16.vlgmr.msra.gmra.mxu0 %vm352_vm1, %v291_v42  ;;  %513 = vmatmul.msk.bf16.vlgmr.msra.gmra.mxu1 %vm352_vm1, %v291_v42 }
  0x96   : > { %v305_v43 = vpop.permute.xlu0 %304 }
  0xb9   : > { %v372_v44 = vpop.f32.mrf.mxu0  ;;  %v385_v46 = vpop.f32.mrf.mxu1 }
  0xba   : > { %v373_v48 = vadd.f32 %v372_v44, %v305_v43  ;;  %v386_v49 = vadd.f32 %v385_v46, %v305_v43 }
  0xbc   : > { %v391_v50 = vadd.f32 %v389_v45, %v373_v48  ;;  %v392_v51 = vadd.f32 %v390_v47, %v386_v49 }
  0xbe   : > { %393 = vst [vmem:[%s288_s23] sm:$0xff] %v391_v50 }
  0xbf   : > { %394 = vst [vmem:[%s288_s23 + $0x8] sm:$0xff] %v392_v51 }
  0xc1   : > { %v374_v52 = vpop.f32.mrf.mxu0  ;;  %v387_v53 = vpop.f32.mrf.mxu1 }
  0xc2 PF: > { %p11_p9 = scmp.ge.s32.totalorder %s620_s19, 4   ;;  %s688_s15 = smov %s571_s16 }
  0xc3   : > { %s689_s16 = smov %s629_s22  ;;  %s690_s17 = smov %s620_s19 }
  0xc4   :  { %13 = sbr.rel (!%p11_p9) target bundleno = 2 (0x2), region = 112 }

</bundles_post_ra>
